<compile_context>
chip_gen: v7x
topology: tpu7x:2x2x1
jax: 0.10.0
libtpu: 0.0.40
codegen_flags: <defaults>
</compile_context>

<pallas_src>
import functools

import jax
import jax.numpy as jnp
from jax.experimental import pallas as pl
from jax.experimental.pallas import tpu as pltpu


def _mlp_kernel(*refs, num_layers):
    """refs = (x_ref, w1_ref, b1_ref, ..., wL_ref, bL_ref, o_ref)."""
    x_ref = refs[0]
    o_ref = refs[-1]
    wb_refs = refs[1:-1]

    h = x_ref[...].astype(jnp.float32)
    for layer in range(num_layers):
        w_ref = wb_refs[2 * layer]
        b_ref = wb_refs[2 * layer + 1]
        w = w_ref[...].astype(jnp.float32)
        b = b_ref[...].astype(jnp.float32)          # (1, d_out) — broadcasts

        if w_ref.shape[0] == 1:
            # Degenerate contraction dim (input feature size 1): a K=1 matmul
            # is just an outer-product broadcast; keep it on the VPU.
            h = h * w + b
        else:
            h = jnp.dot(h, w, preferred_element_type=jnp.float32) + b

        if layer < num_layers - 1:
            h = jnp.maximum(h, 0.0)                 # ReLU on hidden layers
        else:
            h = 1.0 / (1.0 + jnp.exp(-h))           # sigmoid on output layer

    o_ref[...] = h.astype(o_ref.dtype)


def mlp_forward(x, params, block_rows=None):
    """Fused MLP forward.

    x:       (B, d_in) array.
    params:  list of (W, b) with W: (d_in_l, d_out_l), b: (d_out_l,).
             ReLU after every layer except the last, sigmoid on the last.
    """
    B, d_in = x.shape
    num_layers = len(params)
    d_out = params[-1][0].shape[1]
    itemsize = jnp.dtype(x.dtype).itemsize

    if block_rows is None:
        # Whole batch in one tile when small; otherwise large row tiles
        # (multiple of 8) to amortize per-grid-step overhead.
        block_rows = B if B <= 512 else 512
    block_rows = min(block_rows, B)
    grid = (pl.cdiv(B, block_rows),)

    # Flatten (W, b) pairs; biases reshaped to (1, d_out) for a clean 2-D
    # lane layout in VMEM.
    flat_args = []
    in_specs = [pl.BlockSpec((block_rows, d_in), lambda i: (i, 0))]
    for (w, b) in params:
        b2 = b.reshape(1, -1)
        flat_args.append(w)
        flat_args.append(b2)
        # Weights/biases: full-array blocks, constant across the grid
        # (fetched once, kept VMEM-resident).
        in_specs.append(pl.BlockSpec(w.shape, lambda i: (0, 0)))
        in_specs.append(pl.BlockSpec(b2.shape, lambda i: (0, 0)))
    out_spec = pl.BlockSpec((block_rows, d_out), lambda i: (i, 0))

    # Explicit VMEM budget: double-buffered x/out tiles + resident params,
    # with headroom; clamped so it is valid on v5e/v6e/v7x alike.
    param_bytes = sum(w.size + b.size for w, b in params) * 4
    io_bytes = 2 * (block_rows * d_in + block_rows * d_out) * 4
    vmem_limit = int(min(max(2 * (param_bytes + io_bytes) + (4 << 20), 16 << 20),
                         32 << 20))

    # Advisory cost estimate so XLA can overlap this call with neighbors.
    flops = 2 * B * sum(w.shape[0] * w.shape[1] for w, _ in params) + 2 * B * d_out
    transcendentals = B * d_out                       # sigmoid exp
    bytes_accessed = (x.size + B * d_out) * itemsize + param_bytes
    cost = pl.CostEstimate(flops=int(flops),
                           transcendentals=int(transcendentals),
                           bytes_accessed=int(bytes_accessed))

    kernel = functools.partial(_mlp_kernel, num_layers=num_layers)

    return pl.pallas_call(
        kernel,
        out_shape=jax.ShapeDtypeStruct((B, d_out), x.dtype),
        grid_spec=pl.GridSpec(
            grid=grid,
            in_specs=in_specs,
            out_specs=out_spec,
        ),
        compiler_params=pltpu.CompilerParams(
            dimension_semantics=("parallel",),
            vmem_limit_bytes=vmem_limit,
        ),
        cost_estimate=cost,
    )(x, *flat_args)


if __name__ == "__main__":
    key = jax.random.PRNGKey(0)
    batch, hidden, num_layers = 8, 32, 2   # small shapes: MLP(hidden_size=32, num_layers=2)
    k_x, k_w1, k_b1, k_w2, k_b2, k_w3, k_b3 = jax.random.split(key, 7)

    x = jax.random.normal(k_x, (batch, 1), dtype=jnp.float32)

    def init_linear(kw, kb, fan_in, fan_out):
        bound = float(fan_in) ** -0.5
        w = jax.random.uniform(kw, (fan_in, fan_out), jnp.float32, -bound, bound)
        b = jax.random.uniform(kb, (fan_out,), jnp.float32, -bound, bound)
        return w, b

    params = [
        init_linear(k_w1, k_b1, 1, hidden),        # first_hidden_layer
        init_linear(k_w2, k_b2, hidden, hidden),   # rest_hidden_layers[0]
        init_linear(k_w3, k_b3, hidden, 1),        # output_layer
    ]

    out = mlp_forward(x, params)
    out = jax.block_until_ready(out)

    # Pure-JAX reference with the same math as the PyTorch forward.
    h = x
    for i, (w, b) in enumerate(params):
        h = h @ w + b
        if i < len(params) - 1:
            h = jnp.maximum(h, 0.0)
    ref = 1.0 / (1.0 + jnp.exp(-h))

    assert out.shape == (batch, 1) and out.dtype == x.dtype
    assert jnp.max(jnp.abs(out - ref)) < 1e-5
    print("KERNEL_OK")
</pallas_src>

<mosaic_0001>
module attributes {stable_mosaic.version = 11 : i64} {
  func.func @_mlp_kernel(%arg0: i32, %arg1: memref<8x1xf32, #tpu.memory_space<vmem>>, %arg2: memref<1x32xf32, #tpu.memory_space<vmem>>, %arg3: memref<1x32xf32, #tpu.memory_space<vmem>>, %arg4: memref<32x32xf32, #tpu.memory_space<vmem>>, %arg5: memref<1x32xf32, #tpu.memory_space<vmem>>, %arg6: memref<32x1xf32, #tpu.memory_space<vmem>>, %arg7: memref<1x1xf32, #tpu.memory_space<vmem>>, %arg8: memref<8x1xf32, #tpu.memory_space<vmem>>) attributes {dimension_semantics = [#tpu.dimension_semantics<parallel>], iteration_bounds = array<i64: 1>, scalar_prefetch = 0 : i64, scratch_operands = 0 : i64, tpu.core_type = #tpu.core_type<tc>, window_params = [{transform_indices = @transform_0, window_bounds = array<i64: 8, 1>}, {pipeline_mode = #tpu.pipeline_mode<synchronous>, transform_indices = @transform_1, window_bounds = array<i64: 1, 32>}, {pipeline_mode = #tpu.pipeline_mode<synchronous>, transform_indices = @transform_2, window_bounds = array<i64: 1, 32>}, {pipeline_mode = #tpu.pipeline_mode<synchronous>, transform_indices = @transform_3, window_bounds = array<i64: 32, 32>}, {pipeline_mode = #tpu.pipeline_mode<synchronous>, transform_indices = @transform_4, window_bounds = array<i64: 1, 32>}, {pipeline_mode = #tpu.pipeline_mode<synchronous>, transform_indices = @transform_5, window_bounds = array<i64: 32, 1>}, {pipeline_mode = #tpu.pipeline_mode<synchronous>, transform_indices = @transform_6, window_bounds = array<i64: 1, 1>}, {transform_indices = @transform_7, window_bounds = array<i64: 8, 1>}]} {
    %c0 = arith.constant 0 : index
    %c0_0 = arith.constant 0 : index
    %0 = vector.load %arg1[%c0, %c0_0] : memref<8x1xf32, #tpu.memory_space<vmem>>, vector<8x1xf32>
    %c0_1 = arith.constant 0 : index
    %c0_2 = arith.constant 0 : index
    %1 = vector.load %arg2[%c0_1, %c0_2] : memref<1x32xf32, #tpu.memory_space<vmem>>, vector<1x32xf32>
    %c0_3 = arith.constant 0 : index
    %c0_4 = arith.constant 0 : index
    %2 = vector.load %arg3[%c0_3, %c0_4] : memref<1x32xf32, #tpu.memory_space<vmem>>, vector<1x32xf32>
    %3 = vector.broadcast %0 : vector<8x1xf32> to vector<8x32xf32>
    %4 = vector.broadcast %1 : vector<1x32xf32> to vector<8x32xf32>
    %5 = arith.mulf %3, %4 : vector<8x32xf32>
    %6 = vector.broadcast %2 : vector<1x32xf32> to vector<8x32xf32>
    %7 = arith.addf %5, %6 : vector<8x32xf32>
    %cst = arith.constant 0.000000e+00 : f32
    %8 = vector.broadcast %cst : f32 to vector<8x32xf32>
    %9 = arith.maximumf %7, %8 : vector<8x32xf32>
    %c0_5 = arith.constant 0 : index
    %c0_6 = arith.constant 0 : index
    %10 = vector.load %arg4[%c0_5, %c0_6] : memref<32x32xf32, #tpu.memory_space<vmem>>, vector<32x32xf32>
    %c0_7 = arith.constant 0 : index
    %c0_8 = arith.constant 0 : index
    %11 = vector.load %arg5[%c0_7, %c0_8] : memref<1x32xf32, #tpu.memory_space<vmem>>, vector<1x32xf32>
    %cst_9 = arith.constant dense<0.000000e+00> : vector<8x32xf32>
    %12 = tpu.matmul %9, %10, %cst_9 {dimension_numbers = #tpu.dot_dimension_numbers<[1], [0], [0], [1], [0, 0, 1, 1], [], []>} : vector<8x32xf32>, vector<32x32xf32>, vector<8x32xf32> -> vector<8x32xf32>
    %13 = vector.broadcast %11 : vector<1x32xf32> to vector<8x32xf32>
    %14 = arith.addf %12, %13 : vector<8x32xf32>
    %cst_10 = arith.constant 0.000000e+00 : f32
    %15 = vector.broadcast %cst_10 : f32 to vector<8x32xf32>
    %16 = arith.maximumf %14, %15 : vector<8x32xf32>
    %c0_11 = arith.constant 0 : index
    %c0_12 = arith.constant 0 : index
    %17 = vector.load %arg6[%c0_11, %c0_12] : memref<32x1xf32, #tpu.memory_space<vmem>>, vector<32x1xf32>
    %c0_13 = arith.constant 0 : index
    %c0_14 = arith.constant 0 : index
    %18 = vector.load %arg7[%c0_13, %c0_14] : memref<1x1xf32, #tpu.memory_space<vmem>>, vector<1x1xf32>
    %cst_15 = arith.constant dense<0.000000e+00> : vector<8x1xf32>
    %19 = tpu.matmul %16, %17, %cst_15 {dimension_numbers = #tpu.dot_dimension_numbers<[1], [0], [0], [1], [0, 0, 1, 1], [], []>} : vector<8x32xf32>, vector<32x1xf32>, vector<8x1xf32> -> vector<8x1xf32>
    %20 = vector.broadcast %18 : vector<1x1xf32> to vector<8x1xf32>
    %21 = arith.addf %19, %20 : vector<8x1xf32>
    %cst_16 = arith.constant 0.000000e+00 : f32
    %22 = vector.broadcast %cst_16 : f32 to vector<8x1xf32>
    %23 = arith.subf %22, %21 : vector<8x1xf32>
    %24 = math.exp %23 : vector<8x1xf32>
    %cst_17 = arith.constant 1.000000e+00 : f32
    %25 = vector.broadcast %cst_17 : f32 to vector<8x1xf32>
    %26 = arith.addf %25, %24 : vector<8x1xf32>
    %cst_18 = arith.constant 1.000000e+00 : f32
    %27 = vector.broadcast %cst_18 : f32 to vector<8x1xf32>
    %28 = arith.divf %27, %26 : vector<8x1xf32>
    %c0_19 = arith.constant 0 : index
    %c0_20 = arith.constant 0 : index
    %29 = vector.load %arg8[%c0_19, %c0_20] : memref<8x1xf32, #tpu.memory_space<vmem>>, vector<8x1xf32>
    tpu.vector_store %arg8[%c0_19, %c0_20], %28 {strides = array<i32>} : memref<8x1xf32, #tpu.memory_space<vmem>>, vector<8x1xf32>,
    return
  }
  func.func @transform_0(%arg0: i32) -> (i32, i32) {
    %c0_i32 = arith.constant 0 : i32
    %c0_i32_0 = arith.constant 0 : i32
    return %arg0, %c0_i32 : i32, i32
  }
  func.func @transform_1(%arg0: i32) -> (i32, i32) {
    %c0_i32 = arith.constant 0 : i32
    %c0_i32_0 = arith.constant 0 : i32
    %c0_i32_1 = arith.constant 0 : i32
    return %c0_i32, %c0_i32_0 : i32, i32
  }
  func.func @transform_2(%arg0: i32) -> (i32, i32) {
    %c0_i32 = arith.constant 0 : i32
    %c0_i32_0 = arith.constant 0 : i32
    %c0_i32_1 = arith.constant 0 : i32
    return %c0_i32, %c0_i32_0 : i32, i32
  }
  func.func @transform_3(%arg0: i32) -> (i32, i32) {
    %c0_i32 = arith.constant 0 : i32
    %c0_i32_0 = arith.constant 0 : i32
    %c0_i32_1 = arith.constant 0 : i32
    return %c0_i32, %c0_i32_0 : i32, i32
  }
  func.func @transform_4(%arg0: i32) -> (i32, i32) {
    %c0_i32 = arith.constant 0 : i32
    %c0_i32_0 = arith.constant 0 : i32
    %c0_i32_1 = arith.constant 0 : i32
    return %c0_i32, %c0_i32_0 : i32, i32
  }
  func.func @transform_5(%arg0: i32) -> (i32, i32) {
    %c0_i32 = arith.constant 0 : i32
    %c0_i32_0 = arith.constant 0 : i32
    %c0_i32_1 = arith.constant 0 : i32
    return %c0_i32, %c0_i32_0 : i32, i32
  }
  func.func @transform_6(%arg0: i32) -> (i32, i32) {
    %c0_i32 = arith.constant 0 : i32
    %c0_i32_0 = arith.constant 0 : i32
    %c0_i32_1 = arith.constant 0 : i32
    return %c0_i32, %c0_i32_0 : i32, i32
  }
  func.func @transform_7(%arg0: i32) -> (i32, i32) {
    %c0_i32 = arith.constant 0 : i32
    %c0_i32_0 = arith.constant 0 : i32
    return %arg0, %c0_i32 : i32, i32
  }
}

</mosaic_0001>

<bundles_post_ra>
// kernel: tpu_custom_call.1
= control target key start
LH: loop header
LB: loop body
LE: loop exit
PB: predicated region body
PF: predicated region fallthrough
CT: control target
= control target key end

     0   :  { %v292_v0 = vmov 0   ;;  %v293_v2 = vmov 0.0|0.0   ;;  %vm294_vm0 = vmmov 0   ;;  %v295_v9 = vmov 0.0   ;;  %s380_s0 = inlined_call_operand.vmem [shape: f32[8,1], index: 0, kind: input, shape index: {}]   ;;  %s381_s3 = inlined_call_operand.vmem [shape: f32[32,32], index: 3, kind: input, shape index: {}]   ;;  %s382_s5 = inlined_call_operand.vmem [shape: f32[32,1], index: 5, kind: input, shape index: {}]   ;;  %s383_s1 = inlined_call_operand.vmem [shape: f32[1,32], index: 1, kind: input, shape index: {}]   ;;  %s384_s2 = inlined_call_operand.vmem [shape: f32[1,32], index: 2, kind: input, shape index: {}]   ;;  %s385_s6 = inlined_call_operand.<no memory space> [shape: f32[1,1], index: 6, kind: input, shape index: {}]   ;;  %s386_s4 = inlined_call_operand.vmem [shape: f32[1,32], index: 4, kind: input, shape index: {}]   ;;  %s387_s7 = inlined_call_operand.vmem [shape: f32[8,1], index: 7, kind: output, shape index: {}]  }
   0x1   :  { %287 = vset.pattern.permute.xlu0 %v292_v0  ;;  %v28_v1 = vld [vmem:[%s380_s0] sm:$0xff]  ;;  %271 = vmatprep.subr.bf16.mxu0 %v293_v2  ;;  %v52_v4 = vld [vmem:[%s381_s3 + $0x8] sm:$0xff]  ;;  %v53_v6 = vld [vmem:[%s381_s3 + $0x10] sm:$0xff]  ;;  %vm62_vm1 = vcmask 261120   ;;  %v12_v22 = vstv %s385_s6  ;;  %vm227_vm2 = vcmask 7168  }
   0x2   :  { %v51_v3 = vld [vmem:[%s381_s3] sm:$0xff]  ;;  %33 = vperm.xlu0 %287, %v28_v1   ;;  %277 = vmatprep.subr.bf16.mxu1 %v293_v2  ;;  %v54_v7 = vld [vmem:[%s381_s3 + $0x18] sm:$0xff]  ;;  %v138_v11 = vld [vmem:[%s382_s5 + $0x8] sm:$0xff]  ;;  %13 = vst [vmem:[#allocation2] sm:$0x1] %v12_v22 }
   0x3   :  { %v272_v5 = vpack.c.bf16 %v52_v4, %v51_v3  ;;  %v275_v8 = vpack.c.bf16 %v54_v7, %v53_v6  ;;  %257 = vmatprep.mubr.msk.f32.mxu0 %vm294_vm0, %v295_v9  ;;  %268 = vmatprep.mubr.msk.f32.mxu1 %vm294_vm0, %v295_v9  ;;  %v137_v10 = vld [vmem:[%s382_s5] sm:$0xff]  ;;  %v139_v19 = vld [vmem:[%s382_s5 + $0x10] sm:$0xff]  ;;  %v140_v20 = vld [vmem:[%s382_s5 + $0x18] sm:$0xff] }
   0x4   :  { %v278_v12 = vpack.c.bf16 %v138_v11, %v137_v10  ;;  %v233_v13 = vld [vmem:[%s383_s1] ss:$0 sm:$0xff]  ;;  %v281_v21 = vpack.c.bf16 %v140_v20, %v139_v19 }
   0x5   :  { %273 = vmatpush3.bf16.msra.mxu0 %v272_v5  ;;  %v234_v14 = vld [vmem:[%s384_s2] ss:$0 sm:$0xff] }
   0x6   :  { %274 = vmatprep.subr.bf16.mxu0 %v293_v2  ;;  %279 = vmatpush3.bf16.msra.mxu1 %v278_v12  ;;  %v235_v23 = vld [vmem:[%s386_s4] ss:$0 sm:$0xff] }
   0x7   :  { %280 = vmatprep.subr.bf16.mxu1 %v293_v2 }
   0x9   :  { %276 = vmatpush3.bf16.msra.mxu0 %v275_v8  ;;  %v237_v28 = vld [vmem:[#allocation2] ss:$0 sm:$0xff] }
   0xa   :  { %282 = vmatpush3.bf16.msra.mxu1 %v281_v21 }
  0x81   :  { %v34_v15 = vpop.permute.xlu0 %33 }
  0x82   :  { %v42_v16 = vmul.f32 %v233_v13, %v34_v15 }
  0x84   :  { %v49_v17 = vadd.f32 %v234_v14, %v42_v16 }
  0x86   :  { %v50_v18 = vmax.f32 %v49_v17, 0.0 }
  0x88   :  { %258 = vmatmul.mubr.msk.f32.vlgmr.msra.gmra.mrb[0].mxu0 %vm62_vm1, %v50_v18 }
 0x15b   :  { %v132_v24 = vpop.f32.mrb[0].mxu0 }
 0x15c   :  { %v133_v25 = vadd.f32 %v235_v23, %v132_v24  ;;  %v259_v26 = vpop.f32.mrb[1].mxu0 }
 0x15e   :  { %v136_v27 = vmax.f32 %v133_v25, 0.0 }
 0x160   :  { %269 = vmatmul.mubr.msk.f32.vlgmr.msra.gmra.mrb[0].mxu1 %vm62_vm1, %v136_v27 }
 0x233   :  { %v217_v29 = vpop.f32.mrb[0].mxu1 }
 0x234   :  { %v218_v30 = vadd.f32 %v237_v28, %v217_v29  ;;  %v270_v31 = vpop.f32.mrb[1].mxu1 }
 0x236   :  { %v221_v32 = vsub.f32 0.0, %v218_v30 }
 0x238   :  { %v222_v33 = vmul.f32 1.442695, %v221_v32 }
 0x23a   :  { %288 = vpow2.f32 %v222_v33 }
 0x244   :  { %v289_v34 = vpop.eup %288 }
 0x245   :  { %v224_v35 = vadd.f32 1.0, %v289_v34 }
 0x247   :  { %290 = vrcp.f32 %v224_v35 }
 0x251   :  { %v291_v36 = vpop.eup %290 }
 0x252   :  { %228 = vst.msk [vmem:[%s387_s7] sm:$0xff] %vm227_vm2, %v291_v36 }

</bundles_post_ra>
